<compile_context>
chip_gen: v7x
topology: tpu7x:2x2x1
jax: 0.10.0
libtpu: 0.0.40
codegen_flags: <defaults>
</compile_context>

<pallas_src>
import functools

import jax
import jax.numpy as jnp
from jax import lax
from jax.experimental import pallas as pl
from jax.experimental.pallas import tpu as pltpu


def _proto_metric_kernel(sel_ref, x_ref, out_ref, *, inv_ns, inv_emb):
    sel = sel_ref[...]                      # (N, NW_PAD)  exact {0,1}, x dtype
    x = x_ref[...]                          # (TB, N, D)   native dtype

    # Un-normalized prototype sums, laid out (TB, D, NW_PAD): MXU, f32 accumulate.
    #   ps[b, d, w] = sum_n x[b, n, d] * sel[n, w]
    ps = lax.dot_general(x, sel, (((1,), (0,)), ((), ())),
                         preferred_element_type=jnp.float32)

    # f32 view of x for the norm / gram (no-op when the input is already f32).
    xf = x if x.dtype == jnp.float32 else x.astype(jnp.float32)

    # gram[b, n, w] = sum_d x[b, n, d] * ps[b, d, w]   (batched MXU matmul).
    gram = lax.dot_general(xf, ps, (((2,), (1,)), ((0,), (0,))),
                           preferred_element_type=jnp.float32)

    xnorm = jnp.sum(xf * xf, axis=-1, keepdims=True)   # (TB, N, 1)  lane reduce
    pnorm = jnp.sum(ps * ps, axis=1, keepdims=True)    # (TB, 1, NW_PAD) sublane red.

    # -||x - p||^2 with p = ps/ns, averaged over heads:
    #   (2/ns)*gram - ||x||^2 - (1/ns^2)*pnorm, all times 1/emb_num (f32 scalars).
    c_gram = jnp.float32(2.0 * inv_ns * inv_emb)
    c_x = jnp.float32(inv_emb)
    c_p = jnp.float32(inv_ns * inv_ns * inv_emb)
    out_ref[...] = (gram * c_gram - xnorm * c_x - pnorm * c_p).astype(out_ref.dtype)


def _choose_tb(bs, n, d, nw_pad, in_itemsize, vmem_budget_bytes=12 * 1024 * 1024):
    """Largest divisor of bs whose double-buffered blocks fit the VMEM budget,
    keeping >= 2 grid steps (so v7x's two TensorCores both get work)."""
    per_ep = 2 * n * d * in_itemsize + 2 * n * nw_pad * 4
    cap = max(1, vmem_budget_bytes // per_ep)
    best = 1
    for t in range(1, bs + 1):
        if bs % t != 0 or t > cap:
            continue
        if bs >= 2 and bs // t < 2:
            continue
        best = t
    return best


def multi_proto_metric(f, elabel, glabel, bs, nw, ns, nq):
    total, emb_num, f_dim = f.shape
    n = nw * (ns + nq)
    assert total == bs * n
    d = emb_num * f_dim

    # Contiguous reshape only: heads concatenated along the feature axis is
    # exactly what the collapsed math needs (no transpose, no extra HBM pass).
    x = f.reshape(bs, n, d)

    # Keep the contraction dim full-lane; zero padding is inert for prototypes,
    # gram and both norms.
    d_pad = ((d + 127) // 128) * 128
    if d_pad != d:
        x = jnp.pad(x, ((0, 0), (0, 0), (0, d_pad - d)))

    # Lane-dense output / MXU output columns: pad the way axis to >=128.
    nw_pad = max(128, ((nw + 127) // 128) * 128)

    # Episode-invariant support-selection matrix, hoisted out of the kernel body.
    # sel[i, k] = 1 iff sample i is one of the ns support samples of way k (<nw).
    idx = jnp.arange(n)
    way = idx // (ns + nq)
    is_sup = (idx % (ns + nq)) < ns
    sel = ((jnp.arange(nw_pad)[None, :] == way[:, None]) & is_sup[:, None])
    sel = sel.astype(x.dtype)               # exact 0/1 in any float dtype

    tb = _choose_tb(bs, n, d_pad, nw_pad, x.dtype.itemsize)
    grid = (bs // tb,)

    kernel = functools.partial(_proto_metric_kernel,
                               inv_ns=1.0 / float(ns),
                               inv_emb=1.0 / float(emb_num))

    flops = bs * (2 * n * d_pad * nw_pad       # prototype matmul
                  + 2 * n * d_pad * nw_pad     # gram matmul
                  + 2 * n * d_pad              # ||x||^2
                  + 2 * d_pad * nw_pad)        # ||p||^2
    bytes_accessed = (x.size * x.dtype.itemsize
                      + sel.size * sel.dtype.itemsize
                      + bs * n * nw_pad * 4)

    pred_pad = pl.pallas_call(
        kernel,
        out_shape=jax.ShapeDtypeStruct((bs, n, nw_pad), jnp.float32),
        grid=grid,
        in_specs=[pl.BlockSpec((n, nw_pad), lambda b: (0, 0)),
                  pl.BlockSpec((tb, n, d_pad), lambda b: (b, 0, 0))],
        out_specs=pl.BlockSpec((tb, n, nw_pad), lambda b: (b, 0, 0)),
        compiler_params=pltpu.CompilerParams(
            dimension_semantics=("parallel",),
            vmem_limit_bytes=32 * 1024 * 1024),
        cost_estimate=pl.CostEstimate(
            flops=flops, transcendentals=0, bytes_accessed=bytes_accessed),
    )(sel, x)

    # Padded way columns hold -||x||^2 / emb_num garbage -> slice before any
    # consumer (loss / softmax) sees the logits.
    pred = pred_pad[..., :nw]
    return pred, elabel


def multi_proto_metric_ref(f, bs, nw, ns, nq):
    """Pure-JAX reference mirroring the PyTorch code exactly (direct (x-p)^2 form)."""
    _, emb_num, f_dim = f.shape
    n = nw * (ns + nq)
    fr = f.reshape(bs, nw, ns + nq, emb_num, f_dim)
    fr = jnp.transpose(fr, (0, 3, 1, 2, 4))
    emb_all = fr.reshape(bs * emb_num, n, f_dim)
    b2 = bs * emb_num
    sup = emb_all.reshape(b2, nw, ns + nq, f_dim)[:, :, :ns, :].mean(axis=2)
    sup = sup.reshape(b2, 1, nw, f_dim)
    emb_e = emb_all.reshape(b2, n, 1, f_dim)
    pred = -jnp.sum((emb_e - sup) ** 2, axis=-1)
    pred = pred.reshape(bs, emb_num, n, nw).mean(axis=1)
    return pred


if __name__ == "__main__":
    # Small deterministic example; D = emb_num*f_dim = 256 (lane-aligned),
    # N = 32 (sublane-aligned), bs = 4 so episodes get batched 2-per-grid-step
    # while still leaving 2 grid steps for megacore sharding.
    bs, nw, ns, nq = 4, 4, 3, 5
    emb_num, f_dim = 4, 64
    n = nw * (ns + nq)

    key = jax.random.PRNGKey(0)
    k1, _ = jax.random.split(key)
    f = jax.random.normal(k1, (bs * n, emb_num, f_dim), dtype=jnp.float32)
    # elabel is only passed through; build a plausible episode-label tensor.
    elabel = jnp.tile(jnp.repeat(jnp.arange(nw, dtype=jnp.int32), ns + nq)[None, :],
                      (bs, 1))
    glabel = jnp.zeros_like(elabel)  # unused by the forward pass

    pred, elabel_out = multi_proto_metric(f, elabel, glabel, bs, nw, ns, nq)
    pred = jax.block_until_ready(pred)

    pred_ref = multi_proto_metric_ref(f, bs, nw, ns, nq)
    assert pred.shape == (bs, n, nw)
    # Matmul-identity distance has slightly different rounding than (x-p)^2.
    assert jnp.allclose(pred, pred_ref, rtol=1e-3, atol=1e-2), (
        float(jnp.max(jnp.abs(pred - pred_ref))))
    assert (elabel_out == elabel).all()

    print("KERNEL_OK")
</pallas_src>

<mosaic_0001>
module attributes {stable_mosaic.version = 11 : i64} {
  func.func @_proto_metric_kernel(%arg0: i32, %arg1: memref<32x128xf32, #tpu.memory_space<vmem>>, %arg2: memref<2x32x256xf32, #tpu.memory_space<vmem>>, %arg3: memref<2x32x128xf32, #tpu.memory_space<vmem>>) attributes {dimension_semantics = [#tpu.dimension_semantics<parallel>], iteration_bounds = array<i64: 2>, scalar_prefetch = 0 : i64, scratch_operands = 0 : i64, tpu.core_type = #tpu.core_type<tc>, window_params = [{pipeline_mode = #tpu.pipeline_mode<synchronous>, transform_indices = @transform_0, window_bounds = array<i64: 32, 128>}, {transform_indices = @transform_1, window_bounds = array<i64: 2, 32, 256>}, {transform_indices = @transform_2, window_bounds = array<i64: 2, 32, 128>}]} {
    %c0 = arith.constant 0 : index
    %c0_0 = arith.constant 0 : index
    %0 = vector.load %arg1[%c0, %c0_0] : memref<32x128xf32, #tpu.memory_space<vmem>>, vector<32x128xf32>
    %c0_1 = arith.constant 0 : index
    %c0_2 = arith.constant 0 : index
    %c0_3 = arith.constant 0 : index
    %1 = vector.load %arg2[%c0_1, %c0_2, %c0_3] : memref<2x32x256xf32, #tpu.memory_space<vmem>>, vector<2x32x256xf32>
    %cst = arith.constant dense<0.000000e+00> : vector<2x256x128xf32>
    %2 = tpu.matmul %1, %0, %cst {dimension_numbers = #tpu.dot_dimension_numbers<[1], [0], [0, 2], [1], [0, 0, 0, 2, 1, 1], [], []>} : vector<2x32x256xf32>, vector<32x128xf32>, vector<2x256x128xf32> -> vector<2x256x128xf32>
    %cst_4 = arith.constant dense<0.000000e+00> : vector<2x32x128xf32>
    %3 = tpu.matmul %1, %2, %cst_4 {dimension_numbers = #tpu.dot_dimension_numbers<[2], [1], [1], [2], [0, 0, 0, 1, 1, 2], [0], [0]>} : vector<2x32x256xf32>, vector<2x256x128xf32>, vector<2x32x128xf32> -> vector<2x32x128xf32>
    %4 = arith.mulf %1, %1 : vector<2x32x256xf32>
    %cst_5 = arith.constant dense<0.000000e+00> : vector<2x32xf32>
    %5 = vector.multi_reduction <add>, %4, %cst_5 [2] : vector<2x32x256xf32> to vector<2x32xf32>
    %6 = vector.shape_cast %5 : vector<2x32xf32> to vector<2x32x1xf32>
    %7 = arith.mulf %2, %2 : vector<2x256x128xf32>
    %cst_6 = arith.constant dense<0.000000e+00> : vector<2x128xf32>
    %8 = vector.multi_reduction <add>, %7, %cst_6 [1] : vector<2x256x128xf32> to vector<2x128xf32>
    %9 = vector.shape_cast %8 : vector<2x128xf32> to vector<2x1x128xf32>
    %cst_7 = arith.constant 0.166666672 : f32
    %10 = vector.broadcast %cst_7 : f32 to vector<2x32x128xf32>
    %11 = arith.mulf %3, %10 : vector<2x32x128xf32>
    %cst_8 = arith.constant 2.500000e-01 : f32
    %12 = vector.broadcast %cst_8 : f32 to vector<2x32x1xf32>
    %13 = arith.mulf %6, %12 : vector<2x32x1xf32>
    %14 = vector.broadcast %13 : vector<2x32x1xf32> to vector<2x32x128xf32>
    %15 = arith.subf %11, %14 : vector<2x32x128xf32>
    %cst_9 = arith.constant 0.027777778 : f32
    %16 = vector.broadcast %cst_9 : f32 to vector<2x1x128xf32>
    %17 = arith.mulf %9, %16 : vector<2x1x128xf32>
    %18 = vector.broadcast %17 : vector<2x1x128xf32> to vector<2x32x128xf32>
    %19 = arith.subf %15, %18 : vector<2x32x128xf32>
    %c0_10 = arith.constant 0 : index
    %c0_11 = arith.constant 0 : index
    %c0_12 = arith.constant 0 : index
    %20 = vector.load %arg3[%c0_10, %c0_11, %c0_12] : memref<2x32x128xf32, #tpu.memory_space<vmem>>, vector<2x32x128xf32>
    tpu.vector_store %arg3[%c0_10, %c0_11, %c0_12], %19 {strides = array<i32>} : memref<2x32x128xf32, #tpu.memory_space<vmem>>, vector<2x32x128xf32>,
    return
  }
  func.func @transform_0(%arg0: i32) -> (i32, i32) {
    %c0_i32 = arith.constant 0 : i32
    %c0_i32_0 = arith.constant 0 : i32
    %c0_i32_1 = arith.constant 0 : i32
    return %c0_i32, %c0_i32_0 : i32, i32
  }
  func.func @transform_1(%arg0: i32) -> (i32, i32, i32) {
    %c0_i32 = arith.constant 0 : i32
    %c0_i32_0 = arith.constant 0 : i32
    %c0_i32_1 = arith.constant 0 : i32
    return %arg0, %c0_i32, %c0_i32_0 : i32, i32, i32
  }
  func.func @transform_2(%arg0: i32) -> (i32, i32, i32) {
    %c0_i32 = arith.constant 0 : i32
    %c0_i32_0 = arith.constant 0 : i32
    %c0_i32_1 = arith.constant 0 : i32
    return %arg0, %c0_i32, %c0_i32_0 : i32, i32, i32
  }
}

</mosaic_0001>

<bundles_post_ra>
// kernel: tpu_custom_call.1
= control target key start
LH: loop header
LB: loop body
LE: loop exit
PB: predicated region body
PF: predicated region fallthrough
CT: control target
= control target key end

     0   :  { %7 = vsyncpa [#allocation3], 0  ;;  %s2639_s0 = inlined_call_operand.hbm [shape: f32[32,128], index: 0, kind: input, shape index: {}]   ;;  %s2640_s1 = inlined_call_operand.hbm [shape: f32[4,32,256], index: 1, kind: input, shape index: {}]   ;;  %s2641_s2 = inlined_call_operand.hbm [shape: f32[4,32,128], index: 2, kind: output, shape index: {}]  }
   0x1   :  { %8 = vsyncpa [#allocation6], 0 }
   0x2   :  { %10 = vsyncpa [#allocation6 + $0x1], 0 }
   0x3   :  { %11 = vsyncpa [#allocation4], 0 }
   0x4   :  { %13 = vsyncpa [#allocation4 + $0x1], 0  ;;  %s2036_s9 = smov 0   ;;  %s2038_s10 = smov 0  }
   0x5   :  { %s2040_s11 = smov 0   ;;  %s2042_s12 = smov 0  }
   0x6 LB: > { %s2057_s13 = sadd.s32 4294967295, %s2010_s12   ;;  %s1396_s14 = sadd.s32 4294967294, %s2010_s12   ;;  %s2010_s12 = sphi %s2042_s12, %s2661_s12   ;;  %s2006_s11 = sphi %s2040_s11, %s2660_s11   ;;  %s2002_s10 = sphi %s2038_s10, %s2659_s10   ;;  %s1998_s9 = sphi %s2036_s9, %s2658_s9  }
   0x7   : > { %p60_p0 = scmp.ne.s32.totalorder %s2002_s10, %s1998_s9  ;;  %p2642_p1 = scmp.eq.s32.totalorder %s2057_s13, 0 }
   0x8   : > { %p90_p3 = scmp.eq.s32.totalorder %s1396_s14, 1  ;;  %p1397_p5 = scmp.ge.s32.totalorder %s2010_s12, 1 }
   0x9   : > { %p2066_p4 = por %p2642_p1, %p60_p0  ;;  %p97_p7 = scmp.lt.s32.totalorder %s2010_s12, 3 }
   0xa   : > { %p2071_p6 = por %p90_p3, %p60_p0  ;;  %s2012_s18 = smov [#allocation2]  }
   0xb   : > { %s2645_s15 = scalar_select %p2066_p4, 1, 0 }
   0xc   : > { %s2646_s16 = scalar_select %p2071_p6, 1, 0 }
   0xd   : > { %p2076_p8 = pnand %p1397_p5, %p97_p7  ;;  %s109_s19 = sshll.u32 %s2012_s18, 4  ;;  %s2080_s19 = int_to_ptr.vmem [resolvable:$true] %s109_s19 }
   0xe   : > { %s2092_s21 = sadd.s32 1, %s2010_s12   ;;  %s47_s22 = sadd.s32 1, %s2006_s11 }
   0xf   : > { %s2647_s17 = scalar_select %p2076_p8, 1, 0 }
  0x10   : > { %p1826_p9 = pneg %p2076_p8  ;;  %s44_s23 = ssub.s32 %s2010_s12, %s2092_s21 }
  0x11   : > { %s1882_s26 = scalar_lea.hbm %s2639_s0, 512 }
  0x12   : > { %p2087_p11 = pnand %p1826_p9, %p2642_p1  ;;  %p1883_p12 = scmp.ne.s32.totalorder %s2639_s0, %s1882_s26 }
  0x13   : > { %p1889_p5 = scmp.lt.u32.totalorder %s1882_s26, %s2639_s0 }
  0x14   : > { %p1884_p13 = pneg %p2087_p11 }
  0x16   : > { %p1885_p0 = pnand %p1884_p13, %p1883_p12 }
  0x18   : > { %p1886_p3 = pneg %p1885_p0 }
  0x1a   : > { %p1891_p7 = pnand %p1889_p5, %p1886_p3 }
  0x1c   : > { %1894 = shalt.err (!%p1891_p7)
}
  0x1d   : > { %s1895_s3 = scalar_lea.vmem %s2080_s19, 512  ;;  %p1903_p2 = scmp.lt.s32.totalorder %s2080_s19, %s2080_s19 }
  0x1e   : > { %p1896_p9 = scmp.ne.s32.totalorder %s2080_s19, %s1895_s3  ;;  %p1904_p6 = scmp.lt.s32.totalorder %s1895_s3, %s1895_s3 }
  0x20   : > { %p1898_p10 = pnand %p1896_p9, %p1884_p13  ;;  %p1905_p4 = por %p1904_p6, %p1903_p2 }
  0x22   : > { %p1899_p1 = pneg %p1898_p10 }
  0x24   : > { %p1906_p8 = pnand %p1905_p4, %p1899_p1 }
  0x26   : > { %1909 = shalt.err (!%p1906_p8)
}
  0x27   : > { %s2013_s4 = smov 128   ;;  %s2014_s5 = smov 8  }
  0x28   : > { %1829 = dma.hbm_to_vmem [thread:$0]  (!%p2087_p11), %s2639_s0, 512, %s2080_s19, [#allocation3], %s2013_s4, %s2013_s4, %s2014_s5  }
  0x29   : > { %p45_p2 = scmp.eq.s32.totalorder %s44_s23, 0  ;;  %p54_p1 = scmp.ne.s32.totalorder %s2006_s11, %s2002_s10 }
  0x2a   : > { %p55_p4 = scmp.eq.s32.totalorder %s2010_s12, 0  ;;  %p1839_p6 = scmp.lt.s32.totalorder %s2010_s12, 2 }
  0x2b   : > { %s2123_s8 = scalar_select %p45_p2, %s2006_s11, %s47_s22  }
  0x2c   : > { %p56_p8 = por %p55_p4, %p54_p1  ;;  %p2649_p10 = scmp.eq.s32.totalorder %s2057_s13, 1 }
  0x2d   : > { %s123_s18 = sand.u32 1, %s2006_s11   ;;  %s1479_s24 = sshll.u32 %s2010_s12, 11 }
  0x2e   : > { %p2127_p12 = por %p2649_p10, %p54_p1  ;;  %s1400_s25 = sshll.u32 %s123_s18, 7 }
  0x2f   : > { %s2136_s27 = scalar_lea.hbm %s2640_s1, %s1479_s24  ;;  %s127_s19 = scalar_lea.vmem [#allocation5], %s1400_s25 }
  0x30   : > { %s135_s22 = sshll.u32 %s127_s19, 4  ;;  %p2138_p11 = pnand %p1839_p6, %p56_p8  ;;  %s2142_s22 = int_to_ptr.vmem [resolvable:$true] %s135_s22 }
  0x31   : > { %s2144_s28 = scalar_lea.sflag [#allocation6], %s123_s18  ;;  %s1910_s29 = scalar_lea.hbm %s2136_s27, 2048 }
  0x32   : > { %p1911_p13 = scmp.ne.s32.totalorder %s2136_s27, %s1910_s29  ;;  %p1912_p0 = pneg %p2138_p11 }
  0x33   : > { %s1915_s4 = scalar_lea.hbm %s2640_s1, 4096  ;;  %p1916_p7 = scmp.lt.u32.totalorder %s2136_s27, %s2640_s1 }
  0x34   : > { %p1913_p3 = pnand %p1912_p0, %p1911_p13  ;;  %p1917_p9 = scmp.lt.u32.totalorder %s1915_s4, %s1910_s29 }
  0x35   : > { %p1919_p1 = scmp.lt.u32.totalorder %s1910_s29, %s2136_s27 }
  0x36   : > { %p1914_p5 = pneg %p1913_p3  ;;  %p1918_p2 = por %p1917_p9, %p1916_p7 }
  0x38   : > { %p1920_p4 = por %p1919_p1, %p1918_p2 }
  0x3a   : > { %p1921_p6 = pnand %p1920_p4, %p1914_p5 }
  0x3c   : > { %1924 = shalt.err (!%p1921_p6)
}
  0x3d   : > { %s1925_s7 = scalar_lea.vmem %s2142_s22, 2048  ;;  %s2015_s18 = smov [#allocation5]  }
  0x3e   : > { %p1926_p8 = scmp.ne.s32.totalorder %s2142_s22, %s1925_s7  ;;  %s1930_s24 = sshll.u32 %s2015_s18, 4  ;;  %s1931_s24 = int_to_ptr.vmem [resolvable:$false] %s1930_s24 }
  0x3f   : > { %s1932_s25 = scalar_lea.vmem %s1931_s24, 4096  ;;  %p1933_p3 = scmp.lt.s32.totalorder %s2142_s22, %s1931_s24 }
  0x40   : > { %p1928_p10 = pnand %p1926_p8, %p1912_p0  ;;  %p1934_p7 = scmp.lt.s32.totalorder %s1932_s25, %s1925_s7 }
  0x42   : > { %p1929_p13 = pneg %p1928_p10  ;;  %p1935_p9 = por %p1934_p7, %p1933_p3 }
  0x44   : > { %p1936_p2 = pnand %p1935_p9, %p1929_p13 }
  0x46   : > { %1939 = shalt.err (!%p1936_p2)
}
  0x47   : > { %s2016_s20 = smov 256   ;;  %s2017_s26 = smov 16  }
  0x48   : > { %1833 = dma.hbm_to_vmem [thread:$0]  (!%p2138_p11), %s2136_s27, 2048, %s2142_s22, %s2144_s28, %s2016_s20, %s2016_s20, %s2017_s26  }
  0x49   : > { %p2652_p0 = scmp.ne.s32.totalorder %s2647_s17, 0 }
  0x4a   : > { %p2653_p5 = scmp.eq.s32.totalorder (!%p2652_p0), %s2057_s13, 0 }
  0x4b   : > { %147 = sbr.rel (%p2652_p0) target bundleno = 840 (0x348), region = 28 }
  0x52   : > { %1985 = dma.done.wait (%p2653_p5), [#allocation3], 512   ;;  %p2654_p1 = pmov %p2653_p5 }
  0x53   : > { %s2179_s19 = sand.u32 1, %s2002_s10   ;;  %p2655_p11 = scmp.ne.s32.totalorder %s2645_s15, 0 }
  0x54   : > { %1987 = vsyncadd (%p2654_p1), [#allocation3], 4294966784  ;;  %s1406_s29 = sshll.u32 %s2179_s19, 7  ;;  %s154_s30 = scalar_lea.sflag [#allocation6], %s2179_s19 }
  0x55   : > { %s2183_s3 = scalar_lea.vmem [#allocation5], %s1406_s29 }
  0x56   : > { %1989 = dma.done.wait (%p2655_p11), %s154_s30, 2048  }
  0x57   : > { %1991 = vsyncadd (%p2655_p11), %s154_s30, 4294965248  ;;  %v2190_v0 = vld [vmem:[%s2183_s3] sm:$0xff]  ;;  %v2194_v1 = vld [vmem:[%s2183_s3 + $0x8] sm:$0xff]  ;;  %vm328_vm0 = vcmask 261120   ;;  %s1407_s15 = sshll.u32 %s2179_s19, 6  ;;  %s1481_s27 = sshll.u32 %s2057_s13, 10 }
  0x58   : > { %200 = vxpose.xlu0.b32.start [1/4] (short) %v2190_v0, 128  ;;  %v2197_v2 = vld [vmem:[%s2183_s3 + $0x10] sm:$0xff]  ;;  %232 = vxpose.xlu1.b32.start [1/4] (short) %v2194_v1, 128  ;;  %v2201_v3 = vld [vmem:[%s2183_s3 + $0x18] sm:$0xff]  ;;  %v180_v4 = vld [vmem:[#allocation2] sm:$0xff]  ;;  %s2578_s17 = scalar_lea.vmem [#allocation7], %s1407_s15  ;;  %s2592_s4 = scalar_lea.hbm %s2641_s2, %s1481_s27 }
  0x59   : > { %v181_v5 = vld [vmem:[#allocation2 + $0x8] sm:$0xff]  ;;  %v2205_v6 = vld [vmem:[%s2183_s3 + $0x20] sm:$0xff]  ;;  %v182_v8 = vld [vmem:[#allocation2 + $0x10] sm:$0xff]  ;;  %s1311_s22 = sshll.u32 %s2578_s17, 4  ;;  %s1297_s5 = scalar_lea.sflag [#allocation4], %s2179_s19  ;;  %s2594_s22 = int_to_ptr.vmem [resolvable:$true] %s1311_s22 }
  0x5a   : > { %v1742_v7 = vpack.c.bf16 %v181_v5, %v180_v4  ;;  %v183_v9 = vld [vmem:[#allocation2 + $0x18] sm:$0xff]  ;;  %v2209_v10 = vld [vmem:[%s2183_s3 + $0x28] sm:$0xff]  ;;  %v2213_v12 = vld [vmem:[%s2183_s3 + $0x30] sm:$0xff]  ;;  %s1940_s6 = scalar_lea.vmem %s2594_s22, 1024  ;;  %s2018_s13 = smov [#allocation7]  }
  0x5b   : > { %v1746_v11 = vpack.c.bf16 %v183_v9, %v182_v8  ;;  %v2217_v13 = vld [vmem:[%s2183_s3 + $0x38] sm:$0xff]  ;;  %v2222_v14 = vld [vmem:[%s2183_s3 + $0x40] sm:$0xff]  ;;  %v2225_v15 = vld [vmem:[%s2183_s3 + $0x48] sm:$0xff]  ;;  %p1941_p4 = scmp.ne.s32.totalorder %s2594_s22, %s1940_s6  ;;  %s1944_s7 = sshll.u32 %s2018_s13, 4  ;;  %s1945_s7 = int_to_ptr.vmem [resolvable:$false] %s1944_s7 }
  0x5c   : > { %201 = vxpose.xlu0.b32.cont [2/4] (short) %v2197_v2, 128  ;;  %233 = vxpose.xlu1.b32.cont [2/4] (short) %v2201_v3, 128  ;;  %v2229_v16 = vld [vmem:[%s2183_s3 + $0x50] sm:$0xff]  ;;  %v2233_v17 = vld [vmem:[%s2183_s3 + $0x58] sm:$0xff]  ;;  %v2237_v18 = vld [vmem:[%s2183_s3 + $0x60] sm:$0xff]  ;;  %s1946_s18 = scalar_lea.vmem %s1945_s7, 2048  ;;  %p1947_p10 = scmp.lt.s32.totalorder %s2594_s22, %s1945_s7 }
  0x5d   : > { %1743 = vmatprep.subr.bf16.mxu0 %v1742_v7  ;;  %1814 = vmatprep.subr.bf16.mxu1 %v1742_v7  ;;  %v2241_v19 = vld [vmem:[%s2183_s3 + $0x68] sm:$0xff]  ;;  %v2245_v20 = vld [vmem:[%s2183_s3 + $0x70] sm:$0xff]  ;;  %v2249_v21 = vld [vmem:[%s2183_s3 + $0x78] sm:$0xff]  ;;  %p1942_p6 = pnand %p1941_p4, %p2127_p12  ;;  %p1948_p13 = scmp.lt.s32.totalorder %s1946_s18, %s1940_s6 }
  0x5e   : > { %1745 = vmatpush3.bf16.msra.mxu0 %v1742_v7  ;;  %1816 = vmatpush3.bf16.msra.mxu1 %v1742_v7 }
  0x5f   : > { %1747 = vmatprep.subr.bf16.mxu0 %v1746_v11  ;;  %1815 = vmatprep.subr.bf16.mxu1 %v1746_v11  ;;  %p1943_p8 = pneg %p1942_p6  ;;  %p1949_p3 = por %p1948_p13, %p1947_p10 }
  0x60   : > { %202 = vxpose.xlu0.b32.cont [3/4] (short) %v2205_v6, 128  ;;  %234 = vxpose.xlu1.b32.cont [3/4] (short) %v2209_v10, 128 }
  0x61   : > { %p1950_p7 = pnand %p1949_p3, %p1943_p8 }
  0x62   : > { %1749 = vmatpush3.bf16.msra.mxu0 %v1746_v11  ;;  %1817 = vmatpush3.bf16.msra.mxu1 %v1746_v11 }
  0x64   : > { %203 = vxpose.xlu0.b32.end [4/4] (short) %v2213_v12, 128  ;;  %235 = vxpose.xlu1.b32.end [4/4] (short) %v2217_v13, 128 }
  0x95   : > { %264 = vxpose.xlu0.b32.start [1/4] (short) %v2222_v14, 128  ;;  %296 = vxpose.xlu1.b32.start [1/4] (short) %v2225_v15, 128 }
  0x99   : > { %265 = vxpose.xlu0.b32.cont [2/4] (short) %v2229_v16, 128  ;;  %297 = vxpose.xlu1.b32.cont [2/4] (short) %v2233_v17, 128 }
  0x9d   : > { %266 = vxpose.xlu0.b32.cont [3/4] (short) %v2237_v18, 128  ;;  %298 = vxpose.xlu1.b32.cont [3/4] (short) %v2241_v19, 128 }
  0xa1   : > { %267 = vxpose.xlu0.b32.end [4/4] (short) %v2245_v20, 128  ;;  %299 = vxpose.xlu1.b32.end [4/4] (short) %v2249_v21, 128 }
  0xd8   : > { %v216_v22 = vpop.trf.xlu0  ;;  %v248_v23 = vpop.trf.xlu1 }
  0xd9   : > { %1646 = vmatprep.mubr.msk.f32.mxu0 %vm328_vm0, %v216_v22 }
  0xdc   : > { %v217_v24 = vpop.trf.xlu0  ;;  %v249_v25 = vpop.trf.xlu1 }
  0xdd   : > { %1647 = vmatmul.mubr.msk.f32.vlgmr.msra.gmra.mrb[0].mxu0 %vm328_vm0, %v217_v24 }
  0xe0   : > { %v218_v26 = vpop.trf.xlu0  ;;  %v250_v27 = vpop.trf.xlu1 }
  0xe1   : > { %1649 = vmatprep.mubr.msk.f32.mxu0 %vm328_vm0, %v218_v26 }
  0xe4   : > { %v219_v28 = vpop.trf.xlu0  ;;  %v251_v29 = vpop.trf.xlu1 }
  0xe5   : > { %1650 = vmatmul.mubr.msk.f32.gmra.mrb[2].mxu0 %vm328_vm0, %v219_v28 }
  0xe8   : > { %v220_v30 = vpop.trf.xlu0  ;;  %v252_v31 = vpop.trf.xlu1 }
  0xe9   : > { %1652 = vmatprep.mubr.msk.f32.mxu0 %vm328_vm0, %v220_v30 }
  0xec   : > { %v221_v32 = vpop.trf.xlu0  ;;  %v253_v33 = vpop.trf.xlu1 }
  0xed   : > { %1653 = vmatmul.mubr.msk.f32.gmra.mrb[4].mxu0 %vm328_vm0, %v221_v32 }
  0xf0   : > { %v222_v34 = vpop.trf.xlu0  ;;  %v254_v35 = vpop.trf.xlu1 }
  0xf1   : > { %1655 = vmatprep.mubr.msk.f32.mxu0 %vm328_vm0, %v222_v34 }
  0xf4   : > { %v223_v36 = vpop.trf.xlu0  ;;  %v255_v37 = vpop.trf.xlu1 }
  0xf5   : > { %1656 = vmatmul.mubr.msk.f32.gmra.mrb[6].mxu0 %vm328_vm0, %v223_v36 }
  0xf8   : > { %v224_v38 = vpop.trf.xlu0  ;;  %v256_v39 = vpop.trf.xlu1 }
  0xf9   : > { %1658 = vmatprep.mubr.msk.f32.mxu0 %vm328_vm0, %v224_v38 }
  0xfc   : > { %v225_v40 = vpop.trf.xlu0  ;;  %v257_v41 = vpop.trf.xlu1 }
  0xfd   : > { %1659 = vmatmul.mubr.msk.f32.gmra.mrb[8].mxu0 %vm328_vm0, %v225_v40 }
 0x100   : > { %v226_v42 = vpop.trf.xlu0  ;;  %v258_v43 = vpop.trf.xlu1 }
 0x101   : > { %1661 = vmatprep.mubr.msk.f32.mxu0 %vm328_vm0, %v226_v42 }
 0x104   : > { %v227_v44 = vpop.trf.xlu0  ;;  %v259_v45 = vpop.trf.xlu1 }
 0x105   : > { %1662 = vmatmul.mubr.msk.f32.gmra.mrb[10].mxu0 %vm328_vm0, %v227_v44 }
 0x108   : > { %v228_v46 = vpop.trf.xlu0  ;;  %v260_v47 = vpop.trf.xlu1 }
 0x109   : > { %1664 = vmatprep.mubr.msk.f32.mxu0 %vm328_vm0, %v228_v46 }
 0x10c   : > { %v229_v48 = vpop.trf.xlu0  ;;  %v261_v49 = vpop.trf.xlu1 }
 0x10d   : > { %1665 = vmatmul.mubr.msk.f32.gmra.mrb[12].mxu0 %vm328_vm0, %v229_v48 }
 0x110   : > { %v230_v50 = vpop.trf.xlu0  ;;  %v262_v51 = vpop.trf.xlu1 }
 0x111   : > { %1667 = vmatprep.mubr.msk.f32.mxu0 %vm328_vm0, %v230_v50 }
 0x114   : > { %v231_v52 = vpop.trf.xlu0  ;;  %v263_v53 = vpop.trf.xlu1 }
 0x115   : > { %1668 = vmatmul.mubr.msk.f32.gmra.mrb[14].mxu0 %vm328_vm0, %v231_v52 }
 0x116   : > { %1670 = vmatprep.mubr.msk.f32.mxu0 %vm328_vm0, %v248_v23 }
 0x118   : > { %v280_v54 = vpop.trf.xlu0  ;;  %v312_v55 = vpop.trf.xlu1 }
 0x119   : > { %1671 = vmatmul.mubr.msk.f32.gmra.mrb[16].mxu0 %vm328_vm0, %v249_v25 }
 0x11a   : > { %1673 = vmatprep.mubr.msk.f32.mxu0 %vm328_vm0, %v250_v27 }
 0x11c   : > { %v281_v56 = vpop.trf.xlu0  ;;  %v313_v57 = vpop.trf.xlu1 }
 0x11d   : > { %1674 = vmatmul.mubr.msk.f32.gmra.mrb[18].mxu0 %vm328_vm0, %v251_v29 }
 0x11e   : > { %1676 = vmatprep.mubr.msk.f32.mxu0 %vm328_vm0, %v252_v31 }
 0x120   : > { %v282_v58 = vpop.trf.xlu0  ;;  %v314_v60 = vpop.trf.xlu1 }
 0x121   : > { %1677 = vmatmul.mubr.msk.f32.gmra.mrb[20].mxu0 %vm328_vm0, %v253_v33 }
 0x122   : > { %1679 = vmatprep.mubr.msk.f32.mxu0 %vm328_vm0, %v254_v35 }
 0x124   : > { %v283_v59 = vpop.trf.xlu0  ;;  %v315_v62 = vpop.trf.xlu1 }
 0x125   : > { %1680 = vmatmul.mubr.msk.f32.gmra.mrb[22].mxu0 %vm328_vm0, %v255_v37 }
 0x126   : > { %1682 = vmatprep.mubr.msk.f32.mxu0 %vm328_vm0, %v256_v39 }
 0x128   : > { %v284_v61 = vpop.trf.xlu0  ;;  %v316_v5 = vpop.trf.xlu1 }
 0x129   : > { %1683 = vmatmul.mubr.msk.f32.gmra.mrb[24].mxu0 %vm328_vm0, %v257_v41 }
 0x12a   : > { %1685 = vmatprep.mubr.msk.f32.mxu0 %vm328_vm0, %v258_v43 }
 0x12c   : > { %v285_v63 = vpop.trf.xlu0  ;;  %v317_v8 = vpop.trf.xlu1 }
 0x12d   : > { %1686 = vmatmul.mubr.msk.f32.gmra.mrb[26].mxu0 %vm328_vm0, %v259_v45 }
 0x12e   : > { %1688 = vmatprep.mubr.msk.f32.mxu0 %vm328_vm0, %v260_v47 }
 0x130   : > { %v286_v4 = vpop.trf.xlu0  ;;  %v318_v22 = vpop.trf.xlu1 }
 0x131   : > { %1689 = vmatmul.mubr.msk.f32.gmra.mrb[28].mxu0 %vm328_vm0, %v261_v49 }
 0x132   : > { %1691 = vmatprep.mubr.msk.f32.mxu0 %vm328_vm0, %v262_v51 }
 0x134   : > { %v287_v7 = vpop.trf.xlu0  ;;  %v319_v24 = vpop.trf.xlu1 }
 0x135   : > { %1692 = vmatmul.mubr.msk.f32.gmra.mrb[30].mxu0 %vm328_vm0, %v263_v53 }
 0x136   : > { %1694 = vmatprep.mubr.msk.f32.mxu0 %vm328_vm0, %v280_v54 }
 0x138   : > { %v288_v9 = vpop.trf.xlu0  ;;  %v320_v27 = vpop.trf.xlu1 }
 0x139   : > { %1695 = vmatmul.mubr.msk.f32.gmra.mrb[32].mxu0 %vm328_vm0, %v281_v56 }
 0x13a   : > { %1697 = vmatprep.mubr.msk.f32.mxu0 %vm328_vm0, %v282_v58 }
 0x13c   : > { %v289_v11 = vpop.trf.xlu0  ;;  %v321_v29 = vpop.trf.xlu1 }
 0x13d   : > { %1698 = vmatmul.mubr.msk.f32.gmra.mrb[34].mxu0 %vm328_vm0, %v283_v59 }
 0x13e   : > { %1700 = vmatprep.mubr.msk.f32.mxu0 %vm328_vm0, %v284_v61 }
 0x140   : > { %v290_v23 = vpop.trf.xlu0  ;;  %v322_v32 = vpop.trf.xlu1 }
 0x141   : > { %1701 = vmatmul.mubr.msk.f32.gmra.mrb[36].mxu0 %vm328_vm0, %v285_v63 }
 0x142   : > { %1703 = vmatprep.mubr.msk.f32.mxu0 %vm328_vm0, %v286_v4 }
 0x144   : > { %v291_v25 = vpop.trf.xlu0  ;;  %v323_v33 = vpop.trf.xlu1 }
 0x145   : > { %1704 = vmatmul.mubr.msk.f32.gmra.mrb[38].mxu0 %vm328_vm0, %v287_v7 }
 0x146   : > { %1706 = vmatprep.mubr.msk.f32.mxu0 %vm328_vm0, %v288_v9 }
 0x148   : > { %v292_v26 = vpop.trf.xlu0  ;;  %v324_v34 = vpop.trf.xlu1 }
 0x149   : > { %1707 = vmatmul.mubr.msk.f32.gmra.mrb[40].mxu0 %vm328_vm0, %v289_v11  ;;  %1712 = vmatprep.mubr.msk.f32.mxu1 %vm328_vm0, %v292_v26 }
 0x14a   : > { %1709 = vmatprep.mubr.msk.f32.mxu0 %vm328_vm0, %v290_v23 }
 0x14c   : > { %v293_v28 = vpop.trf.xlu0  ;;  %v325_v35 = vpop.trf.xlu1 }
 0x14d   : > { %1710 = vmatmul.mubr.msk.f32.gmra.mrb[42].mxu0 %vm328_vm0, %v291_v25  ;;  %1713 = vmatmul.mubr.msk.f32.vlgmr.msra.gmra.mrb[0].mxu1 %vm328_vm0, %v293_v28  ;;  %v1077_v25 = vmul.f32 %v2194_v1, %v2194_v1 }
 0x150   : > { %v294_v30 = vpop.trf.xlu0  ;;  %v326_v36 = vpop.trf.xlu1 }
 0x151   : > { %1715 = vmatprep.mubr.msk.f32.mxu1 %vm328_vm0, %v294_v30 }
 0x154   : > { %v295_v31 = vpop.trf.xlu0  ;;  %v327_v37 = vpop.trf.xlu1 }
 0x155   : > { %1716 = vmatmul.mubr.msk.f32.gmra.mrb[2].mxu1 %vm328_vm0, %v295_v31  ;;  %v1078_v31 = vmul.f32 %v2197_v2, %v2197_v2 }
 0x156   : > { %1718 = vmatprep.mubr.msk.f32.mxu1 %vm328_vm0, %v312_v55 }
 0x159   : > { %1719 = vmatmul.mubr.msk.f32.gmra.mrb[4].mxu1 %vm328_vm0, %v313_v57 }
 0x15a   : > { %1721 = vmatprep.mubr.msk.f32.mxu1 %vm328_vm0, %v314_v60 }
 0x15d   : > { %1722 = vmatmul.mubr.msk.f32.gmra.mrb[6].mxu1 %vm328_vm0, %v315_v62 }
 0x15e   : > { %1724 = vmatprep.mubr.msk.f32.mxu1 %vm328_vm0, %v316_v5 }
 0x161   : > { %1725 = vmatmul.mubr.msk.f32.gmra.mrb[8].mxu1 %vm328_vm0, %v317_v8 }
 0x162   : > { %1727 = vmatprep.mubr.msk.f32.mxu1 %vm328_vm0, %v318_v22 }
 0x165   : > { %1728 = vmatmul.mubr.msk.f32.gmra.mrb[10].mxu1 %vm328_vm0, %v319_v24  ;;  %v1076_v24 = vmul.f32 %v2190_v0, %v2190_v0 }
 0x166   : > { %1730 = vmatprep.mubr.msk.f32.mxu1 %vm328_vm0, %v320_v27 }
 0x167   : > { %v1092_v27 = vadd.f32 %v1077_v25, %v1076_v24  ;;  %v1090_v25 = vmul.f32 %v2245_v20, %v2245_v20 }
 0x169   : > { %1731 = vmatmul.mubr.msk.f32.gmra.mrb[12].mxu1 %vm328_vm0, %v321_v29  ;;  %1093 = vadd.xlane.f32.xlu0 %v1092_v27  ;;  %v1091_v27 = vmul.f32 %v2249_v21, %v2249_v21 }
 0x16a   : > { %1733 = vmatprep.mubr.msk.f32.mxu1 %vm328_vm0, %v322_v32  ;;  %v1079_v32 = vmul.f32 %v2201_v3, %v2201_v3 }
 0x16d   : > { %1734 = vmatmul.mubr.msk.f32.gmra.mrb[14].mxu1 %vm328_vm0, %v323_v33 }
 0x16e   : > { %1736 = vmatprep.mubr.msk.f32.mxu1 %vm328_vm0, %v324_v34  ;;  %v1095_v34 = vadd.f32 %v1079_v32, %v1078_v31 }
 0x170   : > { %1096 = vadd.xlane.f32.xlu1 %v1095_v34 }
 0x171   : > { %1737 = vmatmul.mubr.msk.f32.gmra.mrb[16].mxu1 %vm328_vm0, %v325_v35  ;;  %v1080_v35 = vmul.f32 %v2205_v6, %v2205_v6 }
 0x172   : > { %1739 = vmatprep.mubr.msk.f32.mxu1 %vm328_vm0, %v326_v36  ;;  %v1081_v36 = vmul.f32 %v2209_v10, %v2209_v10 }
 0x175   : > { %1740 = vmatmul.mubr.msk.f32.gmra.mrb[18].mxu1 %vm328_vm0, %v327_v37  ;;  %v1084_v37 = vmul.f32 %v2222_v14, %v2222_v14 }
 0x176   : > { %970 = vmatprep.mubr.f32.mxu1 %v2194_v1 }
 0x1b0   : > { %v2318_v38 = vpop.f32.mrb[0].mxu0 }
 0x1b1   : > { %v1117_v39 = vmul.f32 %v2318_v38, %v2318_v38  ;;  %v2322_v40 = vpop.f32.mrb[1].mxu0 }
 0x1b2   : > { %v1752_v41 = vpack.c.bf16 %v2318_v38, %v2322_v40  ;;  %v1116_v42 = vmul.f32 %v2322_v40, %v2322_v40 }
 0x1b4   : > { %v1180_v43 = vadd.f32 %v1117_v39, %v1116_v42  ;;  %v1085_v39 = vmul.f32 %v2225_v15, %v2225_v15 }
 0x1b8   : > { %v2328_v44 = vpop.f32.mrb[2].mxu0 }
 0x1b9   : > { %v2330_v45 = vpop.f32.mrb[3].mxu0  ;;  %v1119_v48 = vmul.f32 %v2328_v44, %v2328_v44 }
 0x1ba   : > { %v1756_v46 = vpack.c.bf16 %v2328_v44, %v2330_v45  ;;  %v1118_v47 = vmul.f32 %v2330_v45, %v2330_v45 }
 0x1bc   : > { %v1181_v49 = vadd.f32 %v1180_v43, %v1118_v47  ;;  %v1098_v43 = vadd.f32 %v1081_v36, %v1080_v35  ;;  %v1082_v47 = vmul.f32 %v2213_v12, %v2213_v12 }
 0x1be   : > { %v1182_v50 = vadd.f32 %v1181_v49, %v1119_v48  ;;  %v1083_v48 = vmul.f32 %v2217_v13, %v2217_v13  ;;  %v1104_v49 = vadd.f32 %v1085_v39, %v1084_v37  ;;  %1099 = vadd.xlane.f32.xlu1 %v1098_v43 }
 0x1c0   : > { %v2338_v51 = vpop.f32.mrb[4].mxu0  ;;  %1105 = vadd.xlane.f32.xlu0 %v1104_v49 }
 0x1c1   : > { %v2340_v52 = vpop.f32.mrb[5].mxu0  ;;  %v1121_v55 = vmul.f32 %v2338_v51, %v2338_v51 }
 0x1c2   : > { %v1760_v53 = vpack.c.bf16 %v2338_v51, %v2340_v52  ;;  %v1120_v54 = vmul.f32 %v2340_v52, %v2340_v52 }
 0x1c4   : > { %v1183_v56 = vadd.f32 %v1182_v50, %v1120_v54  ;;  %v1088_v50 = vmul.f32 %v2237_v18, %v2237_v18  ;;  %v1089_v54 = vmul.f32 %v2241_v19, %v2241_v19 }
 0x1c6   : > { %v1184_v57 = vadd.f32 %v1183_v56, %v1121_v55 }
 0x1c8   : > { %v2348_v58 = vpop.f32.mrb[6].mxu0 }
 0x1c9   : > { %v2350_v59 = vpop.f32.mrb[7].mxu0  ;;  %v1123_v62 = vmul.f32 %v2348_v58, %v2348_v58 }
 0x1ca   : > { %v1764_v60 = vpack.c.bf16 %v2348_v58, %v2350_v59  ;;  %v1122_v61 = vmul.f32 %v2350_v59, %v2350_v59 }
 0x1cc   : > { %v1185_v63 = vadd.f32 %v1184_v57, %v1122_v61  ;;  %v1086_v57 = vmul.f32 %v2229_v16, %v2229_v16  ;;  %v1110_v61 = vadd.f32 %v1089_v54, %v1088_v50 }
 0x1ce   : > { %v1186_v4 = vadd.f32 %v1185_v63, %v1123_v62  ;;  %1111 = vadd.xlane.f32.xlu0 %v1110_v61 }
 0x1d0   : > { %v2358_v5 = vpop.f32.mrb[8].mxu0 }
 0x1d1   : > { %v2360_v7 = vpop.f32.mrb[9].mxu0  ;;  %v1125_v11 = vmul.f32 %v2358_v5, %v2358_v5 }
 0x1d2   : > { %v1768_v8 = vpack.c.bf16 %v2358_v5, %v2360_v7  ;;  %v1124_v9 = vmul.f32 %v2360_v7, %v2360_v7 }
 0x1d4   : > { %v1187_v22 = vadd.f32 %v1186_v4, %v1124_v9  ;;  %v1101_v4 = vadd.f32 %v1083_v48, %v1082_v47  ;;  %v1087_v9 = vmul.f32 %v2233_v17, %v2233_v17 }
 0x1d6   : > { %v1188_v23 = vadd.f32 %v1187_v22, %v1125_v11  ;;  %1102 = vadd.xlane.f32.xlu1 %v1101_v4  ;;  %v1107_v24 = vadd.f32 %v1087_v9, %v1086_v57 }
 0x1d8   : > { %v2372_v26 = vpop.f32.mrb[10].mxu0 }
 0x1d9   : > { %v2374_v28 = vpop.f32.mrb[11].mxu0  ;;  %v1127_v1 = vmul.f32 %v2372_v26, %v2372_v26 }
 0x1da   : > { %v1772_v29 = vpack.c.bf16 %v2372_v26, %v2374_v28  ;;  %v1126_v30 = vmul.f32 %v2374_v28, %v2374_v28  ;;  %1108 = vadd.xlane.f32.xlu1 %v1107_v24 }
 0x1dc   : > { %v1189_v33 = vadd.f32 %v1188_v23, %v1126_v30 }
 0x1de   : > { %v1190_v42 = vadd.f32 %v1189_v33, %v1127_v1  ;;  %v1113_v33 = vadd.f32 %v1091_v27, %v1090_v25 }
 0x1e0   : > { %v2402_v55 = vpop.f32.mrb[12].mxu0  ;;  %1114 = vadd.xlane.f32.xlu1 %v1113_v33 }
 0x1e1   : > { %v2404_v56 = vpop.f32.mrb[13].mxu0  ;;  %v1129_v11 = vmul.f32 %v2402_v55, %v2402_v55 }
 0x1e2   : > { %v1776_v62 = vpack.c.bf16 %v2402_v55, %v2404_v56  ;;  %v1128_v63 = vmul.f32 %v2404_v56, %v2404_v56 }
 0x1e4   : > { %v1191_v22 = vadd.f32 %v1190_v42, %v1128_v63 }
 0x1e6   : > { %v1192_v23 = vadd.f32 %v1191_v22, %v1129_v11 }
 0x1e8   : > { %v2420_v30 = vpop.f32.mrb[14].mxu0 }
 0x1e9   : > { %v2422_v31 = vpop.f32.mrb[15].mxu0  ;;  %v1131_v34 = vmul.f32 %v2420_v30, %v2420_v30 }
 0x1ea   : > { %v1780_v32 = vpack.c.bf16 %v2420_v30, %v2422_v31  ;;  %v1130_v1 = vmul.f32 %v2422_v31, %v2422_v31 }
 0x1ec   : > { %v1193_v35 = vadd.f32 %v1192_v23, %v1130_v1  ;;  %v1672_v36 = vpop.f32.mrb[16].mxu0 }
 0x1ed   : > { %v667_v37 = vpop.f32.mrb[17].mxu0  ;;  %v1133_v47 = vmul.f32 %v1672_v36, %v1672_v36 }
 0x1ee   : > { %v1750_v39 = vpack.c.bf16 %v1672_v36, %v667_v37  ;;  %v1132_v42 = vmul.f32 %v667_v37, %v667_v37  ;;  %v1194_v43 = vadd.f32 %v1193_v35, %v1131_v34 }
 0x1f0   : > { %v1195_v48 = vadd.f32 %v1194_v43, %v1132_v42  ;;  %v1675_v49 = vpop.f32.mrb[18].mxu0  ;;  %1751 = vmatprep.subr.bf16.mxu1 %v1750_v39 }
 0x1f1   : > { %v677_v50 = vpop.f32.mrb[19].mxu0  ;;  %1753 = vmatpush3.bf16.msra.mxu1 %v1752_v41  ;;  %v1135_v63 = vmul.f32 %v1675_v49, %v1675_v49 }
 0x1f2   : > { %v1754_v54 = vpack.c.bf16 %v1675_v49, %v677_v50  ;;  %v1134_v57 = vmul.f32 %v677_v50, %v677_v50  ;;  %v1196_v61 = vadd.f32 %v1195_v48, %v1133_v47 }
 0x1f4   : > { %v1197_v4 = vadd.f32 %v1196_v61, %v1134_v57  ;;  %v1678_v9 = vpop.f32.mrb[20].mxu0  ;;  %1755 = vmatprep.subr.bf16.mxu1 %v1754_v54 }
 0x1f5   : > { %v687_v11 = vpop.f32.mrb[21].mxu0  ;;  %1757 = vmatpush3.bf16.msra.mxu1 %v1756_v46  ;;  %v1137_v25 = vmul.f32 %v1678_v9, %v1678_v9 }
 0x1f6   : > { %v1758_v22 = vpack.c.bf16 %v1678_v9, %v687_v11  ;;  %v1136_v23 = vmul.f32 %v687_v11, %v687_v11  ;;  %v1198_v24 = vadd.f32 %v1197_v4, %v1135_v63 }
 0x1f8   : > { %v1199_v27 = vadd.f32 %v1198_v24, %v1136_v23  ;;  %v1681_v1 = vpop.f32.mrb[22].mxu0  ;;  %1759 = vmatprep.subr.bf16.mxu1 %v1758_v22 }
 0x1f9   : > { %v697_v38 = vpop.f32.mrb[23].mxu0  ;;  %1761 = vmatpush3.bf16.msra.mxu1 %v1760_v53  ;;  %v1139_v34 = vmul.f32 %v1681_v1, %v1681_v1 }
 0x1fa   : > { %v1762_v40 = vpack.c.bf16 %v1681_v1, %v697_v38  ;;  %v1138_v41 = vmul.f32 %v697_v38, %v697_v38  ;;  %v1200_v33 = vadd.f32 %v1199_v27, %v1137_v25 }
 0x1fc   : > { %v1201_v35 = vadd.f32 %v1200_v33, %v1138_v41  ;;  %v1684_v36 = vpop.f32.mrb[24].mxu0  ;;  %1763 = vmatprep.subr.bf16.mxu1 %v1762_v40 }
 0x1fd   : > { %v707_v44 = vpop.f32.mrb[25].mxu0  ;;  %1765 = vmatpush3.bf16.msra.mxu1 %v1764_v60  ;;  %v1141_v39 = vmul.f32 %v1684_v36, %v1684_v36 }
 0x1fe   : > { %v1766_v45 = vpack.c.bf16 %v1684_v36, %v707_v44  ;;  %v1140_v46 = vmul.f32 %v707_v44, %v707_v44  ;;  %v1202_v37 = vadd.f32 %v1201_v35, %v1139_v34 }
 0x200   : > { %v1203_v42 = vadd.f32 %v1202_v37, %v1140_v46  ;;  %v1687_v43 = vpop.f32.mrb[26].mxu0  ;;  %1767 = vmatprep.subr.bf16.mxu1 %v1766_v45 }
 0x201   : > { %v717_v51 = vpop.f32.mrb[27].mxu0  ;;  %1769 = vmatpush3.bf16.msra.mxu1 %v1768_v8  ;;  %v1143_v48 = vmul.f32 %v1687_v43, %v1687_v43 }
 0x202   : > { %v1770_v52 = vpack.c.bf16 %v1687_v43, %v717_v51  ;;  %v1142_v53 = vmul.f32 %v717_v51, %v717_v51  ;;  %v1204_v47 = vadd.f32 %v1203_v42, %v1141_v39 }
 0x204   : > { %v1205_v49 = vadd.f32 %v1204_v47, %v1142_v53  ;;  %v1690_v50 = vpop.f32.mrb[28].mxu0  ;;  %1771 = vmatprep.subr.bf16.mxu1 %v1770_v52 }
 0x205   : > { %v727_v58 = vpop.f32.mrb[29].mxu0  ;;  %1773 = vmatpush3.bf16.msra.mxu1 %v1772_v29  ;;  %v1145_v57 = vmul.f32 %v1690_v50, %v1690_v50 }
 0x206   : > { %v1774_v59 = vpack.c.bf16 %v1690_v50, %v727_v58  ;;  %v1144_v60 = vmul.f32 %v727_v58, %v727_v58  ;;  %v1206_v54 = vadd.f32 %v1205_v49, %v1143_v48 }
 0x208   : > { %v1207_v61 = vadd.f32 %v1206_v54, %v1144_v60  ;;  %v1693_v63 = vpop.f32.mrb[30].mxu0  ;;  %1775 = vmatprep.subr.bf16.mxu1 %v1774_v59 }
 0x209   : > { %v737_v5 = vpop.f32.mrb[31].mxu0  ;;  %1777 = vmatpush3.bf16.msra.mxu1 %v1776_v62  ;;  %v1147_v9 = vmul.f32 %v1693_v63, %v1693_v63 }
 0x20a   : > { %v1778_v7 = vpack.c.bf16 %v1693_v63, %v737_v5  ;;  %v1146_v8 = vmul.f32 %v737_v5, %v737_v5  ;;  %v1208_v4 = vadd.f32 %v1207_v61, %v1145_v57 }
 0x20c   : > { %v1209_v11 = vadd.f32 %v1208_v4, %v1146_v8  ;;  %v2451_v22 = vpop.f32.mrb[32].mxu0  ;;  %1779 = vmatprep.subr.bf16.mxu1 %v1778_v7 }
 0x20d   : > { %v1149_v26 = vmul.f32 %v2451_v22, %v2451_v22  ;;  %v2455_v28 = vpop.f32.mrb[33].mxu0  ;;  %1781 = vmatpush3.bf16.msra.mxu1 %v1780_v32 }
 0x20e   : > { %v2460_v29 = vadd.f32 %v1209_v11, %v1147_v9  ;;  %v1784_v55 = vpack.c.bf16 %v2451_v22, %v2455_v28  ;;  %v1148_v56 = vmul.f32 %v2455_v28, %v2455_v28 }
 0x210   : > { %v1217_v62 = vadd.f32 %v1149_v26, %v1148_v56  ;;  %v2466_v23 = vpop.f32.mrb[34].mxu0  ;;  %971 = vmatmul.mubr.f32.vlgmr.msra.gmra.mrb[20].mxu1 %v2190_v0 }
 0x211   : > { %v2469_v24 = vpop.f32.mrb[35].mxu0  ;;  %975 = vmatprep.mubr.f32.mxu1 %v2201_v3  ;;  %v1151_v32 = vmul.f32 %v2466_v23, %v2466_v23 }
 0x212   : > { %v1788_v30 = vpack.c.bf16 %v2466_v23, %v2469_v24  ;;  %v1150_v31 = vmul.f32 %v2469_v24, %v2469_v24 }
 0x214   : > { %v1218_v25 = vadd.f32 %v1217_v62, %v1150_v31  ;;  %v2478_v27 = vpop.f32.mrb[36].mxu0  ;;  %976 = vmatmul.mubr.f32.gmra.mrb[22].mxu1 %v2197_v2 }
 0x215   : > { %v2481_v1 = vpop.f32.mrb[37].mxu0  ;;  %980 = vmatprep.mubr.f32.mxu1 %v2209_v10  ;;  %v1153_v40 = vmul.f32 %v2478_v27, %v2478_v27 }
 0x216   : > { %v1792_v0 = vpack.c.bf16 %v2478_v27, %v2481_v1  ;;  %v1152_v3 = vmul.f32 %v2481_v1, %v2481_v1  ;;  %v1219_v38 = vadd.f32 %v1218_v25, %v1151_v32 }
 0x218   : > { %v1220_v41 = vadd.f32 %v1219_v38, %v1152_v3  ;;  %v2490_v33 = vpop.f32.mrb[38].mxu0  ;;  %981 = vmatmul.mubr.f32.gmra.mrb[24].mxu1 %v2205_v6 }
 0x219   : > { %v2493_v2 = vpop.f32.mrb[39].mxu0  ;;  %985 = vmatprep.mubr.f32.mxu1 %v2217_v13  ;;  %v1155_v36 = vmul.f32 %v2490_v33, %v2490_v33 }
 0x21a   : > { %v1796_v10 = vpack.c.bf16 %v2490_v33, %v2493_v2  ;;  %v1154_v34 = vmul.f32 %v2493_v2, %v2493_v2  ;;  %v1221_v35 = vadd.f32 %v1220_v41, %v1153_v40 }
 0x21c   : > { %v1222_v44 = vadd.f32 %v1221_v35, %v1154_v34  ;;  %v2502_v45 = vpop.f32.mrb[40].mxu0  ;;  %986 = vmatmul.mubr.f32.gmra.mrb[26].mxu1 %v2213_v12 }
 0x21d   : > { %v2505_v6 = vpop.f32.mrb[41].mxu0  ;;  %1055 = vmatprep.mubr.f32.mxu1 %v2225_v15  ;;  %v1157_v39 = vmul.f32 %v2502_v45, %v2502_v45 }
 0x21e   : > { %v1800_v13 = vpack.c.bf16 %v2502_v45, %v2505_v6  ;;  %v1156_v46 = vmul.f32 %v2505_v6, %v2505_v6  ;;  %v1223_v37 = vadd.f32 %v1222_v44, %v1155_v36 }
 0x220   : > { %v1224_v42 = vadd.f32 %v1223_v37, %v1156_v46  ;;  %v2514_v43 = vpop.f32.mrb[42].mxu0  ;;  %v2516_v51 = vpop.f32.mrb[0].mxu1 }
 0x221   : > { %v2518_v12 = vpop.f32.mrb[43].mxu0  ;;  %v2520_v52 = vpop.f32.mrb[1].mxu1  ;;  %v1159_v49 = vmul.f32 %v2514_v43, %v2514_v43  ;;  %v1161_v60 = vmul.f32 %v2516_v51, %v2516_v51 }
 0x222   : > { %v1804_v15 = vpack.c.bf16 %v2514_v43, %v2518_v12  ;;  %v1158_v53 = vmul.f32 %v2518_v12, %v2518_v12  ;;  %v1225_v47 = vadd.f32 %v1224_v42, %v1157_v39  ;;  %v1808_v48 = vpack.c.bf16 %v2516_v51, %v2520_v52 }
 0x223   : > { %v1160_v59 = vmul.f32 %v2520_v52, %v2520_v52  ;;  %v1211_v51 = vrot.slane %v2460_v29, 4 }
 0x224   : > { %v1226_v50 = vadd.f32 %v1225_v47, %v1158_v53 }
 0x225   : > { %v1212_v12 = vadd.f32 %v1211_v51, %v2460_v29 }
 0x226   : > { %v1227_v58 = vadd.f32 %v1226_v50, %v1159_v49 }
 0x227   : > { %v1213_v52 = vrot.slane %v1212_v12, 2 }
 0x228   : > { %v1228_v54 = vadd.f32 %v1227_v58, %v1160_v59  ;;  %v2534_v57 = vpop.f32.mrb[2].mxu1 }
 0x229   : > { %v2536_v61 = vpop.f32.mrb[3].mxu1  ;;  %v1163_v8 = vmul.f32 %v2534_v57, %v2534_v57 }
 0x22a   : > { %v1812_v63 = vpack.c.bf16 %v2534_v57, %v2536_v61  ;;  %v1162_v5 = vmul.f32 %v2536_v61, %v2536_v61  ;;  %v1229_v7 = vadd.f32 %v1228_v54, %v1161_v60 }
 0x22c   : > { %v1230_v4 = vadd.f32 %v1229_v7, %v1162_v5  ;;  %v1720_v9 = vpop.f32.mrb[4].mxu1 }
 0x22d   : > { %v827_v11 = vpop.f32.mrb[5].mxu1  ;;  %v1165_v31 = vmul.f32 %v1720_v9, %v1720_v9 }
 0x22e   : > { %v1782_v26 = vpack.c.bf16 %v1720_v9, %v827_v11  ;;  %v1164_v56 = vmul.f32 %v827_v11, %v827_v11  ;;  %v1231_v62 = vadd.f32 %v1230_v4, %v1163_v8 }
 0x230   : > { %v1232_v32 = vadd.f32 %v1231_v62, %v1164_v56  ;;  %v1723_v25 = vpop.f32.mrb[6].mxu1  ;;  %1783 = vmatprep.subr.bf16.mxu1 %v1782_v26 }
 0x231   : > { %v837_v3 = vpop.f32.mrb[7].mxu1  ;;  %1785 = vmatpush3.bf16.msra.mxu1 %v1784_v55  ;;  %v1167_v34 = vmul.f32 %v1723_v25, %v1723_v25 }
 0x232   : > { %v1786_v38 = vpack.c.bf16 %v1723_v25, %v837_v3  ;;  %v1166_v40 = vmul.f32 %v837_v3, %v837_v3  ;;  %v1233_v41 = vadd.f32 %v1232_v32, %v1165_v31 }
 0x234   : > { %v1234_v35 = vadd.f32 %v1233_v41, %v1166_v40  ;;  %v1726_v36 = vpop.f32.mrb[8].mxu1  ;;  %1787 = vmatprep.subr.bf16.mxu1 %v1786_v38 }
 0x235   : > { %v847_v44 = vpop.f32.mrb[9].mxu1  ;;  %1789 = vmatpush3.bf16.msra.mxu1 %v1788_v30  ;;  %v1169_v42 = vmul.f32 %v1726_v36, %v1726_v36 }
 0x236   : > { %v1790_v46 = vpack.c.bf16 %v1726_v36, %v847_v44  ;;  %v1168_v37 = vmul.f32 %v847_v44, %v847_v44  ;;  %v1235_v39 = vadd.f32 %v1234_v35, %v1167_v34 }
 0x238   : > { %v1236_v53 = vadd.f32 %v1235_v39, %v1168_v37  ;;  %v1729_v47 = vpop.f32.mrb[10].mxu1  ;;  %1791 = vmatprep.subr.bf16.mxu1 %v1790_v46 }
 0x239   : > { %v857_v22 = vpop.f32.mrb[11].mxu1  ;;  %1793 = vmatpush3.bf16.msra.mxu1 %v1792_v0  ;;  %v1171_v50 = vmul.f32 %v1729_v47, %v1729_v47 }
 0x23a   : > { %v1794_v28 = vpack.c.bf16 %v1729_v47, %v857_v22  ;;  %v1170_v55 = vmul.f32 %v857_v22, %v857_v22  ;;  %v1237_v49 = vadd.f32 %v1236_v53, %v1169_v42 }
 0x23c   : > { %v1238_v58 = vadd.f32 %v1237_v49, %v1170_v55  ;;  %v1732_v59 = vpop.f32.mrb[12].mxu1  ;;  %1795 = vmatprep.subr.bf16.mxu1 %v1794_v28 }
 0x23d   : > { %v867_v23 = vpop.f32.mrb[13].mxu1  ;;  %1797 = vmatpush3.bf16.msra.mxu1 %v1796_v10  ;;  %v1173_v54 = vmul.f32 %v1732_v59, %v1732_v59 }
 0x23e   : > { %v1798_v24 = vpack.c.bf16 %v1732_v59, %v867_v23  ;;  %v1172_v30 = vmul.f32 %v867_v23, %v867_v23  ;;  %v1239_v60 = vadd.f32 %v1238_v58, %v1171_v50 }
 0x240   : > { %v1240_v5 = vadd.f32 %v1239_v60, %v1172_v30  ;;  %v1735_v7 = vpop.f32.mrb[14].mxu1  ;;  %1799 = vmatprep.subr.bf16.mxu1 %v1798_v24 }
 0x241   : > { %v877_v27 = vpop.f32.mrb[15].mxu1  ;;  %1801 = vmatpush3.bf16.msra.mxu1 %v1800_v13  ;;  %v1175_v4 = vmul.f32 %v1735_v7, %v1735_v7 }
 0x242   : > { %v1802_v1 = vpack.c.bf16 %v1735_v7, %v877_v27  ;;  %v1174_v0 = vmul.f32 %v877_v27, %v877_v27  ;;  %v1241_v8 = vadd.f32 %v1240_v5, %v1173_v54 }
 0x244   : > { %v1242_v9 = vadd.f32 %v1241_v8, %v1174_v0  ;;  %v1738_v11 = vpop.f32.mrb[16].mxu1  ;;  %1803 = vmatprep.subr.bf16.mxu1 %v1802_v1 }
 0x245   : > { %v887_v33 = vpop.f32.mrb[17].mxu1  ;;  %1805 = vmatpush3.bf16.msra.mxu1 %v1804_v15  ;;  %v1177_v56 = vmul.f32 %v1738_v11, %v1738_v11  ;;  %v1214_v15 = vadd.f32 %v1213_v52, %v1212_v12 }
 0x246   : > { %v1806_v2 = vpack.c.bf16 %v1738_v11, %v887_v33  ;;  %v1176_v10 = vmul.f32 %v887_v33, %v887_v33  ;;  %v1243_v26 = vadd.f32 %v1242_v9, %v1175_v4 }
 0x248   : > { %v1244_v62 = vadd.f32 %v1243_v26, %v1176_v10  ;;  %v1741_v31 = vpop.f32.mrb[18].mxu1  ;;  %1807 = vmatprep.subr.bf16.mxu1 %v1806_v2 }
 0x249   : > { %v897_v45 = vpop.f32.mrb[19].mxu1  ;;  %1809 = vmatpush3.bf16.msra.mxu1 %v1808_v48  ;;  %v1179_v25 = vmul.f32 %v1741_v31, %v1741_v31  ;;  %v1094_v48 = vpop.xlane.xlu0 %1093 }
 0x24a   : > { %v1810_v6 = vpack.c.bf16 %v1741_v31, %v897_v45  ;;  %v1178_v13 = vmul.f32 %v897_v45, %v897_v45  ;;  %v1245_v32 = vadd.f32 %v1244_v62, %v1177_v56 }
 0x24c   : > { %v1246_v3 = vadd.f32 %v1245_v32, %v1178_v13  ;;  %1811 = vmatprep.subr.bf16.mxu1 %v1810_v6 }
 0x24d   : > { %1813 = vmatpush3.bf16.msra.mxu1 %v1812_v63  ;;  %v1262_v63 = vmul.f32 0.25, %v1094_v48  ;;  %v1106_v1 = vpop.xlane.xlu0 %1105 }
 0x24e   : > { %v1247_v43 = vadd.f32 %v1246_v3, %v1179_v25  ;;  %v1266_v11 = vmul.f32 0.25, %v1106_v1 }
 0x250   : > { %1056 = vmatmul.mubr.f32.vlgmr.msra.gmra.mrb[28].mxu1 %v2222_v14  ;;  %v1215_v14 = vrot.slane %v1214_v15, 1  ;;  %v1248_v60 = vrot.slane %v1247_v43, 4 }
 0x251   : > { %1060 = vmatprep.mubr.f32.mxu1 %v2233_v17  ;;  %v1097_v17 = vpop.xlane.xlu1 %1096 }
 0x252   : > { %v1216_v61 = vadd.f32 %v1215_v14, %v1214_v15  ;;  %v1263_v35 = vmul.f32 0.25, %v1097_v17  ;;  %v1249_v54 = vadd.f32 %v1248_v60, %v1247_v43 }
 0x254   : > { %1061 = vmatmul.mubr.f32.gmra.mrb[30].mxu1 %v2229_v16  ;;  %v1250_v5 = vrot.slane %v1249_v54, 2 }
 0x255   : > { %1065 = vmatprep.mubr.f32.mxu1 %v2241_v19  ;;  %v1100_v40 = vpop.xlane.xlu1 %1099 }
 0x256   : > { %v1264_v42 = vmul.f32 0.25, %v1100_v40  ;;  %v1251_v7 = vadd.f32 %v1250_v5, %v1249_v54 }
 0x258   : > { %1066 = vmatmul.mubr.f32.gmra.mrb[32].mxu1 %v2237_v18  ;;  %v1252_v27 = vrot.slane %v1251_v7, 1 }
 0x259   : > { %1070 = vmatprep.mubr.f32.mxu1 %v2249_v21 }
 0x25a   : > { %v1253_v4 = vadd.f32 %v1252_v27, %v1251_v7 }
 0x25b   : > { %v1112_v6 = vpop.xlane.xlu0 %1111 }
 0x25c   : > { %1071 = vmatmul.mubr.f32.gmra.mrb[34].mxu1 %v2245_v20  ;;  %v1278_v20 = vmul.f32 0.027777778, %v1216_v61  ;;  %v1279_v56 = vmul.f32 0.027777778, %v1253_v4  ;;  %v1268_v12 = vmul.f32 0.25, %v1112_v6 }
 0x263   : > { %v1103_v53 = vpop.xlane.xlu1 %1102 }
 0x264   : > { %v1265_v58 = vmul.f32 0.25, %v1103_v53 }
 0x267   : > { %v1109_v33 = vpop.xlane.xlu1 %1108 }
 0x268   : > { %v1267_v45 = vmul.f32 0.25, %v1109_v33 }
 0x26d   : > { %v1115_v52 = vpop.xlane.xlu1 %1114 }
 0x26e   : > { %v1269_v61 = vmul.f32 0.25, %v1115_v52 }
 0x2e3   : > { %v1582_v57 = vpop.f32.mrb[20].mxu1 }
 0x2e4   : > { %v1583_v16 = vpop.f32.mrb[21].mxu1 }
 0x2e5   : > { %v1584_v19 = vadd.f32 %v1583_v16, %v1582_v57 }
 0x2e7   : > { %v1254_v18 = vmul.f32 0.16666667, %v1584_v19  ;;  %v1585_v38 = vpop.f32.mrb[22].mxu1 }
 0x2e8   : > { %v1586_v21 = vpop.f32.mrb[23].mxu1 }
 0x2e9   : > { %v1270_v41 = vsub.f32 %v1254_v18, %v1262_v63  ;;  %v1587_v34 = vadd.f32 %v1586_v21, %v1585_v38 }
 0x2eb   : > { %v1280_v29 = vsub.f32 %v1270_v41, %v1278_v20  ;;  %v1255_v36 = vmul.f32 0.16666667, %v1587_v34  ;;  %v1588_v44 = vpop.f32.mrb[24].mxu1 }
 0x2ec   : > { %v1589_v46 = vpop.f32.mrb[25].mxu1 }
 0x2ed   : > { %1288 = vst [vmem:[%s2578_s17] sm:$0xff] %v1280_v29  ;;  %v1271_v37 = vsub.f32 %v1255_v36, %v1263_v35  ;;  %v1590_v39 = vadd.f32 %v1589_v46, %v1588_v44 }
 0x2ef   : > { %v1281_v47 = vsub.f32 %v1271_v37, %v1278_v20  ;;  %v1256_v22 = vmul.f32 0.16666667, %v1590_v39  ;;  %v1591_v28 = vpop.f32.mrb[26].mxu1 }
 0x2f0   : > { %v1592_v55 = vpop.f32.mrb[27].mxu1 }
 0x2f1   : > { %1289 = vst [vmem:[%s2578_s17 + $0x8] sm:$0xff] %v1281_v47  ;;  %v1272_v49 = vsub.f32 %v1256_v22, %v1264_v42  ;;  %v1593_v50 = vadd.f32 %v1592_v55, %v1591_v28 }
 0x2f3   : > { %v1282_v59 = vsub.f32 %v1272_v49, %v1278_v20  ;;  %v1257_v23 = vmul.f32 0.16666667, %v1593_v50 }
 0x2f5   : > { %1290 = vst [vmem:[%s2578_s17 + $0x10] sm:$0xff] %v1282_v59  ;;  %v1273_v24 = vsub.f32 %v1257_v23, %v1265_v58 }
 0x2f7   : > { %v1283_v30 = vsub.f32 %v1273_v24, %v1278_v20 }
 0x2f9   : > { %1291 = vst [vmem:[%s2578_s17 + $0x18] sm:$0xff] %v1283_v30 }
 0x323   : > { %v1626_v0 = vpop.f32.mrb[28].mxu1 }
 0x324   : > { %v1627_v8 = vpop.f32.mrb[29].mxu1 }
 0x325   : > { %v1628_v9 = vadd.f32 %v1627_v8, %v1626_v0 }
 0x327   : > { %v1258_v2 = vmul.f32 0.16666667, %v1628_v9  ;;  %v1629_v10 = vpop.f32.mrb[30].mxu1 }
 0x328   : > { %v1630_v26 = vpop.f32.mrb[31].mxu1 }
 0x329   : > { %v1274_v62 = vsub.f32 %v1258_v2, %v1266_v11  ;;  %v1631_v31 = vadd.f32 %v1630_v26, %v1629_v10 }
 0x32b   : > { %v1284_v13 = vsub.f32 %v1274_v62, %v1279_v56  ;;  %v1259_v32 = vmul.f32 0.16666667, %v1631_v31  ;;  %v1632_v25 = vpop.f32.mrb[32].mxu1 }
 0x32c   : > { %v1633_v3 = vpop.f32.mrb[33].mxu1 }
 0x32d   : > { %1292 = vst [vmem:[%s2578_s17 + $0x20] sm:$0xff] %v1284_v13  ;;  %v1275_v43 = vsub.f32 %v1259_v32, %v1267_v45  ;;  %v1634_v51 = vadd.f32 %v1633_v3, %v1632_v25 }
 0x32f   : > { %v1285_v15 = vsub.f32 %v1275_v43, %v1279_v56  ;;  %v1260_v14 = vmul.f32 0.16666667, %v1634_v51  ;;  %v1635_v48 = vpop.f32.mrb[34].mxu1 }
 0x330   : > { %v1636_v17 = vpop.f32.mrb[35].mxu1 }
 0x331   : > { %1293 = vst [vmem:[%s2578_s17 + $0x28] sm:$0xff] %v1285_v15  ;;  %v1276_v57 = vsub.f32 %v1260_v14, %v1268_v12  ;;  %v1637_v16 = vadd.f32 %v1636_v17, %v1635_v48 }
 0x333   : > { %v1286_v19 = vsub.f32 %v1276_v57, %v1279_v56  ;;  %v1261_v63 = vmul.f32 0.16666667, %v1637_v16 }
 0x335   : > { %1294 = vst [vmem:[%s2578_s17 + $0x30] sm:$0xff] %v1286_v19  ;;  %v1277_v18 = vsub.f32 %v1261_v63, %v1269_v61 }
 0x337   : > { %v1287_v38 = vsub.f32 %v1277_v18, %v1279_v56 }
 0x339   : > { %1295 = vst [vmem:[%s2578_s17 + $0x38] sm:$0xff] %v1287_v38 }
 0x33a   : > { %1953 = shalt.err (!%p1950_p7)
}
 0x33b   : > { %s1954_s24 = scalar_lea.hbm %s2592_s4, 1024  ;;  %s1958_s26 = scalar_lea.hbm %s2641_s2, 2048 }
 0x33c   : > { %p1955_p9 = scmp.ne.s32.totalorder %s2592_s4, %s1954_s24  ;;  %p1959_p5 = scmp.lt.u32.totalorder %s2592_s4, %s2641_s2 }
 0x33d   : > { %p1960_p1 = scmp.lt.u32.totalorder %s1958_s26, %s1954_s24  ;;  %p1962_p4 = scmp.lt.u32.totalorder %s1954_s24, %s2592_s4 }
 0x33e   : > { %p1956_p2 = pnand %p1955_p9, %p2127_p12 }
 0x33f   : > { %p1961_p11 = por %p1960_p1, %p1959_p5 }
 0x340   : > { %p1957_p0 = pneg %p1956_p2 }
 0x341   : > { %p1963_p6 = por %p1962_p4, %p1961_p11 }
 0x343   : > { %p1964_p8 = pnand %p1963_p6, %p1957_p0 }
 0x345   : > { %1967 = shalt.err (!%p1964_p8)
}
 0x346   : > { %s2019_s3 = smov 128   ;;  %s2020_s15 = smov 8  }
 0x347   : > { %1824 = dma.vmem_to_hbm [thread:$0]  (%p2127_p12), %s2594_s22, 1024, %s2592_s4, %s1297_s5, %s2019_s3, %s2019_s3, %s2020_s15  }
 0x348 PF: > { %s1326_s17 = sand.u32 1, %s1998_s9   ;;  %p2656_p10 = scmp.ne.s32.totalorder %s2646_s16, 0 }
 0x349   : > { %p2657_p13 = scmp.ge.s32.totalorder %s2010_s12, 2  ;;  %s1327_s27 = scalar_lea.sflag [#allocation4], %s1326_s17 }
 0x34b   : > { %p1835_p3 = pnand %p2657_p13, %p2656_p10 }
 0x34d   : > { %1993 = dma.done.wait (!%p1835_p3), %s1327_s27, 1024  }
 0x34e   : > { %1995 = vsyncadd (!%p1835_p3), %s1327_s27, 4294966272  ;;  %p16_p7 = scmp.ge.s32.totalorder %s2092_s21, 4   ;;  %s2658_s9 = smov %s2002_s10 }
 0x34f   : > { %s2659_s10 = smov %s2006_s11  ;;  %s2660_s11 = smov %s2123_s8 }
 0x350   : > { %s2661_s12 = smov %s2092_s21  ;;  %18 = sbr.rel (!%p16_p7) target bundleno = 6 (0x6), region = 78 }
 0x357   :  { %1332 = vsyncpa [#allocation3], 1 }
 0x358   :  { %1334 = vsyncpa [#allocation3 + $0x1], 1 }
 0x359   :  { %1335 = vsyncpa [#allocation6], 1 }
 0x35a   :  { %1337 = vsyncpa [#allocation6 + $0x1], 1 }
 0x35b   :  { %1338 = vsyncpa [#allocation4], 1 }
 0x35c   :  { %1340 = vsyncpa [#allocation4 + $0x1], 1 }

</bundles_post_ra>
